<compile_context>
chip_gen: v7x
topology: tpu7x:2x2x1
jax: 0.10.0
libtpu: 0.0.40
codegen_flags: <defaults>
</compile_context>

<pallas_src>
import jax
import jax.numpy as jnp
from jax.experimental import pallas as pl
from jax.experimental.pallas import tpu as pltpu


def _quick_gelu(x):
    # quick_gelu(x) = x * sigmoid(1.702 x) == x * 0.5 * (1 + tanh(0.851 x))
    # (tanh form: single EUP push per element, no divide on the VALU path)
    return x * (0.5 * jnp.tanh(0.851 * x) + 0.5)


# --------------------------------------------------------------------------
# Kernels
# --------------------------------------------------------------------------
def _make_resident_kernel(n_chunks, ic):
    """Resident-weight kernel: grid is 1-D over token tiles, both full weight
    matrices live in VMEM.  The intermediate axis is chunked with *static*
    ref slices (free) to bound the f32 temporary; partial fc2 results are
    accumulated in f32 and written once."""

    def kernel(x_ref, w1_ref, b1_ref, w2_ref, b2_ref, o_ref):
        x = x_ref[...]

        def fc_chunk(w1c, b1c, w2c):
            h = jnp.dot(x, w1c, preferred_element_type=jnp.float32)
            h = _quick_gelu(h + b1c)
            return jnp.dot(h.astype(w2c.dtype), w2c,
                           preferred_element_type=jnp.float32)

        if n_chunks == 1:
            acc = fc_chunk(w1_ref[...], b1_ref[...], w2_ref[...])
        else:
            acc = jnp.zeros(o_ref.shape, jnp.float32)
            for c in range(n_chunks):          # static offsets -> free slicing
                lo = c * ic
                acc = acc + fc_chunk(w1_ref[:, lo:lo + ic],
                                     b1_ref[:, lo:lo + ic],
                                     w2_ref[lo:lo + ic, :])
        o_ref[...] = (acc + b2_ref[...]).astype(o_ref.dtype)

    return kernel


def _mlp_kernel_tiled(x_ref, w1_ref, b1_ref, w2_ref, b2_ref, o_ref, acc_ref):
    """Fallback when resident weights would not fit VMEM: grid reduction over
    the intermediate axis with an f32 VMEM accumulator."""
    j = pl.program_id(1)

    @pl.when(j == 0)
    def _init():
        acc_ref[...] = jnp.zeros_like(acc_ref)

    h = jnp.dot(x_ref[...], w1_ref[...], preferred_element_type=jnp.float32)
    h = _quick_gelu(h + b1_ref[...])
    acc_ref[...] += jnp.dot(h.astype(w2_ref.dtype), w2_ref[...],
                            preferred_element_type=jnp.float32)

    @pl.when(j == pl.num_programs(1) - 1)
    def _finalize():
        o_ref[...] = (acc_ref[...] + b2_ref[...]).astype(o_ref.dtype)


# --------------------------------------------------------------------------
# Parameter prep (one-time, at weight-load time)
# --------------------------------------------------------------------------
def prepare_qwen2vl_mlp_params(w1, b1, w2, b2, compute_dtype=jnp.bfloat16):
    """PyTorch Linear layout: w1 [I, H], w2 [H, I].  Returns [in, out]
    transposed compute-dtype weights plus f32 row-vector biases."""
    I, H = w1.shape
    assert w2.shape == (H, I) and b1.shape == (I,) and b2.shape == (H,)
    w1_t = jnp.asarray(w1, compute_dtype).T              # (H, I)
    w2_t = jnp.asarray(w2, compute_dtype).T              # (I, H)
    b1_r = jnp.asarray(b1, jnp.float32).reshape(1, I)
    b2_r = jnp.asarray(b2, jnp.float32).reshape(1, H)
    return w1_t, b1_r, w2_t, b2_r


def _vmem_capacity_bytes():
    try:
        return int(pltpu.get_tpu_info().vmem_capacity_bytes)
    except Exception:
        return 64 << 20      # conservative default: v7x per-TensorCore VMEM


# --------------------------------------------------------------------------
# Wrapper
# --------------------------------------------------------------------------
def qwen2vl_vision_mlp_prepared(x, params, *, tm=None, ti=None, ic=None):
    """x: [S, H] activations; params from prepare_qwen2vl_mlp_params."""
    w1_t, b1_r, w2_t, b2_r = params
    S, H = x.shape
    I = w1_t.shape[1]
    assert w1_t.shape == (H, I) and w2_t.shape == (I, H)
    assert b1_r.shape == (1, I) and b2_r.shape == (1, H)

    compute_dtype = w1_t.dtype
    out_dtype = x.dtype
    xc = x.astype(compute_dtype)

    w_isz = jnp.dtype(compute_dtype).itemsize
    x_isz = w_isz
    o_isz = jnp.dtype(out_dtype).itemsize

    cap = _vmem_capacity_bytes()
    budget = int(cap * 0.75)

    # ---- token tile: multiple of 16 (bf16 sublane packing) or full S -------
    if tm is None:
        tm = 512
    tm = S if tm >= S else max(16, (tm // 16) * 16)

    # ---- in-kernel chunk of the intermediate axis (resident path) ----------
    if ic is None:
        for cand in (1024, 512, 256, 128):
            if I % cand == 0:
                ic = cand
                break
        else:
            ic = I
    if ic > I or I % ic != 0:
        ic = I

    # ---- VMEM footprint models (account ALL buffers, not just weights) -----
    def resident_footprint(tm_, single_buffer):
        wbuf = (1 if single_buffer else 2) * 2 * H * I * w_isz   # fc1 + fc2
        return (wbuf
                + 2 * (I + H) * 4                      # biases (f32)
                + 2 * tm_ * H * (x_isz + o_isz)        # x / out double buffers
                + tm_ * H * 4                          # f32 output accumulator
                + tm_ * ic * 4)                        # f32 intermediate chunk

    def tiled_footprint(tm_, ti_):
        return (2 * 2 * H * ti_ * w_isz                # dbl-buffered weight tiles
                + 2 * (ti_ + H) * 4                    # biases
                + 2 * tm_ * H * (x_isz + o_isz)        # x / out double buffers
                + tm_ * H * 4                          # f32 acc scratch
                + tm_ * ti_ * 4)                       # f32 intermediate h

    def grid_ti_candidates():
        # Prefer 256-multiples (feed the 2x256^2 MXU fully), then 128.
        c256 = [d for d in range(I - 256, 0, -256)
                if d % 256 == 0 and I % d == 0]
        c128 = [d for d in range(I - 128, 0, -128)
                if d % 128 == 0 and d % 256 != 0 and I % d == 0]
        return c256 + c128

    # ---- pick ti: prefer fully-resident weights (ti == I) ------------------
    if ti is not None:
        assert ti == I or (I % ti == 0 and ti % 128 == 0), \
            "ti must be I or a 128-multiple divisor of I"
    else:
        if resident_footprint(tm, True) <= budget:
            ti = I
        else:
            # Try a smaller token tile before giving up on resident weights.
            tm_try = tm
            while tm_try > 128 and resident_footprint(tm_try, True) > budget:
                tm_try = max(128, (tm_try // 2 // 16) * 16)
            if resident_footprint(tm_try, True) <= budget:
                tm, ti = tm_try, I
            else:
                ti = None
                for cand in grid_ti_candidates():
                    if tiled_footprint(tm, cand) <= budget:
                        ti = cand
                        break
                if ti is None:
                    # Nothing fits cleanly (e.g. I not 128-granular).
                    # TODO(synk): pl.Element-style tiling for such shapes.
                    cands = grid_ti_candidates()
                    ti = cands[-1] if cands else I

    n_i = pl.cdiv(S, tm)
    weight_passes = 1 if ti == I else n_i   # tiled path re-streams per token tile
    cost = pl.CostEstimate(
        flops=4 * S * H * I,
        transcendentals=S * I,
        bytes_accessed=int(weight_passes * 2 * H * I * w_isz + (I + H) * 4
                           + S * H * (x.dtype.itemsize + o_isz)),
    )

    # ----------------------- resident fast path -----------------------------
    if ti == I:
        n_chunks = I // ic if ic < I else 1
        ic_eff = ic if n_chunks > 1 else I
        kernel = _make_resident_kernel(n_chunks, ic_eff)

        def _run(single_buffer):
            wkw = {"pipeline_mode": pl.Buffered(1)} if single_buffer else {}
            vmem_limit = int(min(cap, max(32 << 20,
                                          resident_footprint(tm, single_buffer)
                                          * 1.25)))
            return pl.pallas_call(
                kernel,
                out_shape=jax.ShapeDtypeStruct((S, H), out_dtype),
                grid_spec=pltpu.PrefetchScalarGridSpec(
                    num_scalar_prefetch=0,
                    grid=(n_i,),
                    in_specs=[
                        pl.BlockSpec((tm, H), lambda i: (i, 0)),        # x tile
                        pl.BlockSpec((H, I), lambda i: (0, 0), **wkw),  # fc1 w
                        pl.BlockSpec((1, I), lambda i: (0, 0)),         # fc1 b
                        pl.BlockSpec((I, H), lambda i: (0, 0), **wkw),  # fc2 w
                        pl.BlockSpec((1, H), lambda i: (0, 0)),         # fc2 b
                    ],
                    out_specs=pl.BlockSpec((tm, H), lambda i: (i, 0)),
                ),
                compiler_params=pltpu.CompilerParams(
                    dimension_semantics=("parallel",),
                    vmem_limit_bytes=vmem_limit,
                ),
                cost_estimate=cost,
            )(xc, w1_t, b1_r, w2_t, b2_r)

        try:
            return _run(True)
        except Exception:
            # pipeline_mode=pl.Buffered(1) unsupported on this jax version:
            # fall back to default (double-buffered) specs.  The constant block
            # index still means the weights are DMA'd only once.
            return _run(False)

    # ------------------- tiled fallback (grid reduction over I) -------------
    n_j = I // ti
    vmem_limit = int(min(cap, max(32 << 20, tiled_footprint(tm, ti) * 1.25)))
    return pl.pallas_call(
        _mlp_kernel_tiled,
        out_shape=jax.ShapeDtypeStruct((S, H), out_dtype),
        grid_spec=pltpu.PrefetchScalarGridSpec(
            num_scalar_prefetch=0,
            grid=(n_i, n_j),
            in_specs=[
                pl.BlockSpec((tm, H), lambda i, j: (i, 0)),   # x tile
                pl.BlockSpec((H, ti), lambda i, j: (0, j)),   # fc1 weight tile
                pl.BlockSpec((1, ti), lambda i, j: (0, j)),   # fc1 bias tile
                pl.BlockSpec((ti, H), lambda i, j: (j, 0)),   # fc2 weight tile
                pl.BlockSpec((1, H), lambda i, j: (0, 0)),    # fc2 bias
            ],
            out_specs=pl.BlockSpec((tm, H), lambda i, j: (i, 0)),
            scratch_shapes=[pltpu.VMEM((tm, H), jnp.float32)],
        ),
        compiler_params=pltpu.CompilerParams(
            dimension_semantics=("parallel", "arbitrary"),
            vmem_limit_bytes=vmem_limit,
        ),
        cost_estimate=cost,
    )(xc, w1_t, b1_r, w2_t, b2_r)


def qwen2vl_vision_mlp(x, w1, b1, w2, b2, *, compute_dtype=jnp.bfloat16,
                       tm=None, ti=None, ic=None):
    """Convenience wrapper (PyTorch layouts).  Prefer prepare_* once at load
    time + qwen2vl_vision_mlp_prepared so the transpose stays off the hot path."""
    params = prepare_qwen2vl_mlp_params(w1, b1, w2, b2, compute_dtype)
    return qwen2vl_vision_mlp_prepared(x, params, tm=tm, ti=ti, ic=ic)


def ref_mlp(x, w1, b1, w2, b2):
    h = x @ w1.T + b1
    h = _quick_gelu(h)
    return h @ w2.T + b2


if __name__ == "__main__":
    # Small shapes consistent with the module: 64 tokens, hidden 64, intermediate 256.
    S, H, I = 64, 64, 256
    key = jax.random.PRNGKey(0)
    kx, kw1, kb1, kw2, kb2 = jax.random.split(key, 5)

    x = jax.random.normal(kx, (S, H), dtype=jnp.float32)
    # PyTorch nn.Linear layout: weight is [out_features, in_features].
    w1 = jax.random.normal(kw1, (I, H), dtype=jnp.float32) * 0.05
    b1 = jax.random.normal(kb1, (I,), dtype=jnp.float32) * 0.01
    w2 = jax.random.normal(kw2, (H, I), dtype=jnp.float32) * 0.05
    b2 = jax.random.normal(kb2, (H,), dtype=jnp.float32) * 0.01

    expected = ref_mlp(x, w1, b1, w2, b2)

    # One-time parameter prep (hoisted out of the per-call hot path).
    params = prepare_qwen2vl_mlp_params(w1, b1, w2, b2)

    # 1) Default path: fully resident weights, fast-path kernel (no accumulator
    #    scratch, no reduction grid axis).
    out = jax.block_until_ready(qwen2vl_vision_mlp_prepared(x, params))
    assert out.shape == (S, H) and out.dtype == x.dtype
    assert jnp.allclose(out, expected, atol=3e-2, rtol=3e-2), \
        "mismatch vs reference (resident path)"

    # 2) Resident weights with in-kernel chunking of the intermediate axis
    #    and multiple token tiles.
    out2 = jax.block_until_ready(
        qwen2vl_vision_mlp_prepared(x, params, tm=32, ic=128))
    assert jnp.allclose(out2, expected, atol=3e-2, rtol=3e-2), \
        "mismatch vs reference (chunked resident path)"

    # 3) Grid-level reduction over I fallback (f32 accumulator + pl.when).
    out3 = jax.block_until_ready(
        qwen2vl_vision_mlp_prepared(x, params, tm=32, ti=128))
    assert jnp.allclose(out3, expected, atol=3e-2, rtol=3e-2), \
        "mismatch vs reference (tiled fallback path)"

    print("KERNEL_OK")
</pallas_src>

<mosaic_0001>
module attributes {stable_mosaic.version = 11 : i64} {
  func.func @kernel(%arg0: i32, %arg1: memref<64x64xbf16, #tpu.memory_space<vmem>>, %arg2: memref<64x256xbf16, #tpu.memory_space<vmem>>, %arg3: memref<1x256xf32, #tpu.memory_space<vmem>>, %arg4: memref<256x64xbf16, #tpu.memory_space<vmem>>, %arg5: memref<1x64xf32, #tpu.memory_space<vmem>>, %arg6: memref<64x64xf32, #tpu.memory_space<vmem>>) attributes {dimension_semantics = [#tpu.dimension_semantics<parallel>], iteration_bounds = array<i64: 1>, scalar_prefetch = 0 : i64, scratch_operands = 0 : i64, tpu.core_type = #tpu.core_type<tc>, window_params = [{transform_indices = @transform_0, window_bounds = array<i64: 64, 64>}, {pipeline_mode = #tpu.pipeline_mode<synchronous>, transform_indices = @transform_1, window_bounds = array<i64: 64, 256>}, {pipeline_mode = #tpu.pipeline_mode<synchronous>, transform_indices = @transform_2, window_bounds = array<i64: 1, 256>}, {pipeline_mode = #tpu.pipeline_mode<synchronous>, transform_indices = @transform_3, window_bounds = array<i64: 256, 64>}, {pipeline_mode = #tpu.pipeline_mode<synchronous>, transform_indices = @transform_4, window_bounds = array<i64: 1, 64>}, {transform_indices = @transform_5, window_bounds = array<i64: 64, 64>}]} {
    %c0 = arith.constant 0 : index
    %c0_0 = arith.constant 0 : index
    %0 = vector.load %arg1[%c0, %c0_0] : memref<64x64xbf16, #tpu.memory_space<vmem>>, vector<64x64xbf16>
    %c0_1 = arith.constant 0 : index
    %c0_2 = arith.constant 0 : index
    %1 = vector.load %arg2[%c0_1, %c0_2] : memref<64x256xbf16, #tpu.memory_space<vmem>>, vector<64x256xbf16>
    %c0_3 = arith.constant 0 : index
    %c0_4 = arith.constant 0 : index
    %2 = vector.load %arg3[%c0_3, %c0_4] : memref<1x256xf32, #tpu.memory_space<vmem>>, vector<1x256xf32>
    %c0_5 = arith.constant 0 : index
    %c0_6 = arith.constant 0 : index
    %3 = vector.load %arg4[%c0_5, %c0_6] : memref<256x64xbf16, #tpu.memory_space<vmem>>, vector<256x64xbf16>
    %cst = arith.constant dense<0.000000e+00> : vector<64x256xf32>
    %4 = tpu.matmul %0, %1, %cst {dimension_numbers = #tpu.dot_dimension_numbers<[1], [0], [0], [1], [0, 0, 1, 1], [], []>} : vector<64x64xbf16>, vector<64x256xbf16>, vector<64x256xf32> -> vector<64x256xf32>
    %5 = vector.broadcast %2 : vector<1x256xf32> to vector<64x256xf32>
    %6 = arith.addf %4, %5 : vector<64x256xf32>
    %cst_7 = arith.constant 8.510000e-01 : f32
    %7 = vector.broadcast %cst_7 : f32 to vector<64x256xf32>
    %8 = arith.mulf %7, %6 : vector<64x256xf32>
    %9 = math.tanh %8 : vector<64x256xf32>
    %cst_8 = arith.constant 5.000000e-01 : f32
    %10 = vector.broadcast %cst_8 : f32 to vector<64x256xf32>
    %11 = arith.mulf %10, %9 : vector<64x256xf32>
    %cst_9 = arith.constant 5.000000e-01 : f32
    %12 = vector.broadcast %cst_9 : f32 to vector<64x256xf32>
    %13 = arith.addf %11, %12 : vector<64x256xf32>
    %14 = arith.mulf %6, %13 : vector<64x256xf32>
    %15 = arith.truncf %14 : vector<64x256xf32> to vector<64x256xbf16>
    %cst_10 = arith.constant dense<0.000000e+00> : vector<64x64xf32>
    %16 = tpu.matmul %15, %3, %cst_10 {dimension_numbers = #tpu.dot_dimension_numbers<[1], [0], [0], [1], [0, 0, 1, 1], [], []>} : vector<64x256xbf16>, vector<256x64xbf16>, vector<64x64xf32> -> vector<64x64xf32>
    %c0_11 = arith.constant 0 : index
    %c0_12 = arith.constant 0 : index
    %17 = vector.load %arg5[%c0_11, %c0_12] : memref<1x64xf32, #tpu.memory_space<vmem>>, vector<1x64xf32>
    %18 = vector.broadcast %17 : vector<1x64xf32> to vector<64x64xf32>
    %19 = arith.addf %16, %18 : vector<64x64xf32>
    %c0_13 = arith.constant 0 : index
    %c0_14 = arith.constant 0 : index
    %20 = vector.load %arg6[%c0_13, %c0_14] : memref<64x64xf32, #tpu.memory_space<vmem>>, vector<64x64xf32>
    tpu.vector_store %arg6[%c0_13, %c0_14], %19 {strides = array<i32>} : memref<64x64xf32, #tpu.memory_space<vmem>>, vector<64x64xf32>,
    return
  }
  func.func @transform_0(%arg0: i32) -> (i32, i32) {
    %c0_i32 = arith.constant 0 : i32
    %c0_i32_0 = arith.constant 0 : i32
    return %arg0, %c0_i32 : i32, i32
  }
  func.func @transform_1(%arg0: i32) -> (i32, i32) {
    %c0_i32 = arith.constant 0 : i32
    %c0_i32_0 = arith.constant 0 : i32
    %c0_i32_1 = arith.constant 0 : i32
    return %c0_i32, %c0_i32_0 : i32, i32
  }
  func.func @transform_2(%arg0: i32) -> (i32, i32) {
    %c0_i32 = arith.constant 0 : i32
    %c0_i32_0 = arith.constant 0 : i32
    %c0_i32_1 = arith.constant 0 : i32
    return %c0_i32, %c0_i32_0 : i32, i32
  }
  func.func @transform_3(%arg0: i32) -> (i32, i32) {
    %c0_i32 = arith.constant 0 : i32
    %c0_i32_0 = arith.constant 0 : i32
    %c0_i32_1 = arith.constant 0 : i32
    return %c0_i32, %c0_i32_0 : i32, i32
  }
  func.func @transform_4(%arg0: i32) -> (i32, i32) {
    %c0_i32 = arith.constant 0 : i32
    %c0_i32_0 = arith.constant 0 : i32
    %c0_i32_1 = arith.constant 0 : i32
    return %c0_i32, %c0_i32_0 : i32, i32
  }
  func.func @transform_5(%arg0: i32) -> (i32, i32) {
    %c0_i32 = arith.constant 0 : i32
    %c0_i32_0 = arith.constant 0 : i32
    return %arg0, %c0_i32 : i32, i32
  }
}

module attributes {stable_mosaic.version = 11 : i64} {
  func.func @kernel(%arg0: i32, %arg1: memref<64x64xbf16, #tpu.memory_space<vmem>>, %arg2: memref<64x256xbf16, #tpu.memory_space<vmem>>, %arg3: memref<1x256xf32, #tpu.memory_space<vmem>>, %arg4: memref<256x64xbf16, #tpu.memory_space<vmem>>, %arg5: memref<1x64xf32, #tpu.memory_space<vmem>>, %arg6: memref<64x64xf32, #tpu.memory_space<vmem>>) attributes {dimension_semantics = [#tpu.dimension_semantics<parallel>], iteration_bounds = array<i64: 1>, scalar_prefetch = 0 : i64, scratch_operands = 0 : i64, tpu.core_type = #tpu.core_type<tc>, window_params = [{transform_indices = @transform_0, window_bounds = array<i64: 64, 64>}, {pipeline_mode = #tpu.pipeline_mode<synchronous>, transform_indices = @transform_1, window_bounds = array<i64: 64, 256>}, {pipeline_mode = #tpu.pipeline_mode<synchronous>, transform_indices = @transform_2, window_bounds = array<i64: 1, 256>}, {pipeline_mode = #tpu.pipeline_mode<synchronous>, transform_indices = @transform_3, window_bounds = array<i64: 256, 64>}, {pipeline_mode = #tpu.pipeline_mode<synchronous>, transform_indices = @transform_4, window_bounds = array<i64: 1, 64>}, {transform_indices = @transform_5, window_bounds = array<i64: 64, 64>}]} {
    %c0 = arith.constant 0 : index
    %c0_0 = arith.constant 0 : index
    %0 = vector.load %arg1[%c0, %c0_0] : memref<64x64xbf16, #tpu.memory_space<vmem>>, vector<64x64xbf16>
    %c0_1 = arith.constant 0 : index
    %c0_2 = arith.constant 0 : index
    %1 = vector.load %arg2[%c0_1, %c0_2] : memref<64x256xbf16, #tpu.memory_space<vmem>>, vector<64x256xbf16>
    %c0_3 = arith.constant 0 : index
    %c0_4 = arith.constant 0 : index
    %2 = vector.load %arg3[%c0_3, %c0_4] : memref<1x256xf32, #tpu.memory_space<vmem>>, vector<1x256xf32>
    %c0_5 = arith.constant 0 : index
    %c0_6 = arith.constant 0 : index
    %3 = vector.load %arg4[%c0_5, %c0_6] : memref<256x64xbf16, #tpu.memory_space<vmem>>, vector<256x64xbf16>
    %cst = arith.constant dense<0.000000e+00> : vector<64x256xf32>
    %4 = tpu.matmul %0, %1, %cst {dimension_numbers = #tpu.dot_dimension_numbers<[1], [0], [0], [1], [0, 0, 1, 1], [], []>} : vector<64x64xbf16>, vector<64x256xbf16>, vector<64x256xf32> -> vector<64x256xf32>
    %5 = vector.broadcast %2 : vector<1x256xf32> to vector<64x256xf32>
    %6 = arith.addf %4, %5 : vector<64x256xf32>
    %cst_7 = arith.constant 8.510000e-01 : f32
    %7 = vector.broadcast %cst_7 : f32 to vector<64x256xf32>
    %8 = arith.mulf %7, %6 : vector<64x256xf32>
    %9 = math.tanh %8 : vector<64x256xf32>
    %cst_8 = arith.constant 5.000000e-01 : f32
    %10 = vector.broadcast %cst_8 : f32 to vector<64x256xf32>
    %11 = arith.mulf %10, %9 : vector<64x256xf32>
    %cst_9 = arith.constant 5.000000e-01 : f32
    %12 = vector.broadcast %cst_9 : f32 to vector<64x256xf32>
    %13 = arith.addf %11, %12 : vector<64x256xf32>
    %14 = arith.mulf %6, %13 : vector<64x256xf32>
    %15 = arith.truncf %14 : vector<64x256xf32> to vector<64x256xbf16>
    %cst_10 = arith.constant dense<0.000000e+00> : vector<64x64xf32>
    %16 = tpu.matmul %15, %3, %cst_10 {dimension_numbers = #tpu.dot_dimension_numbers<[1], [0], [0], [1], [0, 0, 1, 1], [], []>} : vector<64x256xbf16>, vector<256x64xbf16>, vector<64x64xf32> -> vector<64x64xf32>
    %c0_11 = arith.constant 0 : index
    %c0_12 = arith.constant 0 : index
    %17 = vector.load %arg5[%c0_11, %c0_12] : memref<1x64xf32, #tpu.memory_space<vmem>>, vector<1x64xf32>
    %18 = vector.broadcast %17 : vector<1x64xf32> to vector<64x64xf32>
    %19 = arith.addf %16, %18 : vector<64x64xf32>
    %c0_13 = arith.constant 0 : index
    %c0_14 = arith.constant 0 : index
    %20 = vector.load %arg6[%c0_13, %c0_14] : memref<64x64xf32, #tpu.memory_space<vmem>>, vector<64x64xf32>
    tpu.vector_store %arg6[%c0_13, %c0_14], %19 {strides = array<i32>} : memref<64x64xf32, #tpu.memory_space<vmem>>, vector<64x64xf32>,
    return
  }
  func.func @transform_0(%arg0: i32) -> (i32, i32) {
    %c0_i32 = arith.constant 0 : i32
    %c0_i32_0 = arith.constant 0 : i32
    return %arg0, %c0_i32 : i32, i32
  }
  func.func @transform_1(%arg0: i32) -> (i32, i32) {
    %c0_i32 = arith.constant 0 : i32
    %c0_i32_0 = arith.constant 0 : i32
    %c0_i32_1 = arith.constant 0 : i32
    return %c0_i32, %c0_i32_0 : i32, i32
  }
  func.func @transform_2(%arg0: i32) -> (i32, i32) {
    %c0_i32 = arith.constant 0 : i32
    %c0_i32_0 = arith.constant 0 : i32
    %c0_i32_1 = arith.constant 0 : i32
    return %c0_i32, %c0_i32_0 : i32, i32
  }
  func.func @transform_3(%arg0: i32) -> (i32, i32) {
    %c0_i32 = arith.constant 0 : i32
    %c0_i32_0 = arith.constant 0 : i32
    %c0_i32_1 = arith.constant 0 : i32
    return %c0_i32, %c0_i32_0 : i32, i32
  }
  func.func @transform_4(%arg0: i32) -> (i32, i32) {
    %c0_i32 = arith.constant 0 : i32
    %c0_i32_0 = arith.constant 0 : i32
    %c0_i32_1 = arith.constant 0 : i32
    return %c0_i32, %c0_i32_0 : i32, i32
  }
  func.func @transform_5(%arg0: i32) -> (i32, i32) {
    %c0_i32 = arith.constant 0 : i32
    %c0_i32_0 = arith.constant 0 : i32
    return %arg0, %c0_i32 : i32, i32
  }
}

</mosaic_0001>

<bundles_post_ra>
// kernel: tpu_custom_call.1
= control target key start
LH: loop header
LB: loop body
LE: loop exit
PB: predicated region body
PF: predicated region fallthrough
CT: control target
= control target key end

     0   :  { %v689_v2 = vmov 0   ;;  %vm142_vm0 = vcmask 523264   ;;  %s893_s0 = inlined_call_operand.vmem [shape: bf16[64,64], index: 0, kind: input, shape index: {}]   ;;  %s894_s1 = inlined_call_operand.vmem [shape: bf16[64,256], index: 1, kind: input, shape index: {}]   ;;  %s895_s2 = inlined_call_operand.vmem [shape: f32[1,256], index: 2, kind: input, shape index: {}]   ;;  %s896_s3 = inlined_call_operand.vmem [shape: bf16[256,64], index: 3, kind: input, shape index: {}]   ;;  %s897_s4 = inlined_call_operand.vmem [shape: f32[1,64], index: 4, kind: input, shape index: {}]   ;;  %s898_s5 = inlined_call_operand.hbm [shape: f32[64,64], index: 5, kind: output, shape index: {}]  }
   0x1   :  { %v601_v0 = vld [vmem:[%s894_s1 + $0x4] ss:$8 sps:$4 sm:$0xff]   ;;  %v603_v1 = vld [vmem:[%s894_s1] ss:$8 sps:$4 sm:$0xff]   ;;  %187 = vmatprep.mubr.bf16.mxu0 %v689_v2  ;;  %v604_v3 = vld [vmem:[%s894_s1 + $0x14] ss:$8 sps:$4 sm:$0xff]  }
   0x2   :  { %155 = vmatprep.subr.bf16.mxu0 %v601_v0  ;;  %v606_v4 = vld [vmem:[%s894_s1 + $0x10] ss:$8 sps:$4 sm:$0xff]   ;;  %v607_v5 = vld [vmem:[%s894_s1 + $0x24] ss:$8 sps:$4 sm:$0xff]   ;;  %v609_v6 = vld [vmem:[%s894_s1 + $0x20] ss:$8 sps:$4 sm:$0xff]  }
   0x3   :  { %156 = vmatpush1.bf16.msra.mxu0 %v603_v1  ;;  %v610_v7 = vld [vmem:[%s894_s1 + $0x34] ss:$8 sps:$4 sm:$0xff]   ;;  %v617_v8 = vld [vmem:[%s896_s3 + $0x40] sm:$0xff]   ;;  %v612_v9 = vld [vmem:[%s894_s1 + $0x30] ss:$8 sps:$4 sm:$0xff]  }
   0x4   :  { %157 = vmatprep.subr.bf16.mxu0 %v604_v3  ;;  %v618_v10 = vld [vmem:[%s896_s3] sm:$0xff]   ;;  %581 = vmatprep.subr.bf16.mxu1 %v617_v8 }
   0x5   :  { %v613_v11 = vld [vmem:[%s893_s0] sm:$0xff]   ;;  %589 = vmatpush3.bf16.msra.mxu1 %v618_v10 }
   0x7   :  { %158 = vmatpush1.bf16.msra.mxu0 %v606_v4 }
   0x8   :  { %159 = vmatprep.subr.bf16.mxu0 %v607_v5 }
   0xb   :  { %160 = vmatpush1.bf16.msra.mxu0 %v609_v6 }
   0xc   :  { %161 = vmatprep.subr.bf16.mxu0 %v610_v7 }
   0xf   :  { %162 = vmatpush1.bf16.msra.mxu0 %v612_v9 }
  0x10   :  { %541 = vmatprep.subr.bf16.mxu0 %v617_v8 }
  0x12   :  { %520 = vmatmul.mubr.msk.bf16.vlgmr.msra.gmra.mrb[0].mxu0 %vm142_vm0, %v613_v11 }
  0x13   :  { %197 = vmatprep.mubr.bf16.mxu0 %v689_v2  ;;  %542 = vmatpush3.bf16.msra.mxu0 %v618_v10 }
  0x14   :  { %10 = vsyncpa [#allocation3], 0  ;;  %v614_v12 = vld [vmem:[%s893_s0 + $0x8] sm:$0xff]   ;;  %v615_v13 = vld [vmem:[%s893_s0 + $0x10] sm:$0xff]   ;;  %v72_v29 = vlaneseq }
  0x15   :  { %v616_v14 = vld [vmem:[%s893_s0 + $0x18] sm:$0xff]   ;;  %v619_v15 = vld [vmem:[%s896_s3 + $0x48] sm:$0xff]   ;;  %v621_v17 = vld [vmem:[%s896_s3 + $0x50] sm:$0xff]  }
  0x16   :  { %v620_v16 = vld [vmem:[%s896_s3 + $0x8] sm:$0xff]   ;;  %543 = vmatprep.subr.bf16.mxu0 %v619_v15  ;;  %582 = vmatprep.subr.bf16.mxu1 %v619_v15  ;;  %v622_v18 = vld [vmem:[%s896_s3 + $0x10] sm:$0xff]   ;;  %v623_v19 = vld [vmem:[%s896_s3 + $0x58] sm:$0xff]   ;;  %v73_v30 = vshrl.u32 %v72_v29, 7 }
  0x17   :  { %544 = vmatpush3.bf16.msra.mxu0 %v620_v16  ;;  %590 = vmatpush3.bf16.msra.mxu1 %v620_v16  ;;  %v624_v20 = vld [vmem:[%s896_s3 + $0x18] sm:$0xff]   ;;  %v625_v21 = vld [vmem:[%s896_s3 + $0x60] sm:$0xff]   ;;  %v627_v23 = vld [vmem:[%s896_s3 + $0x68] sm:$0xff]  }
  0x18   :  { %545 = vmatprep.subr.bf16.mxu0 %v621_v17  ;;  %583 = vmatprep.subr.bf16.mxu1 %v621_v17  ;;  %v626_v22 = vld [vmem:[%s896_s3 + $0x20] sm:$0xff]   ;;  %v628_v24 = vld [vmem:[%s896_s3 + $0x28] sm:$0xff]   ;;  %v629_v25 = vld [vmem:[%s896_s3 + $0x70] sm:$0xff]   ;;  %v74_v31 = vsub.s32 0, %v73_v30  ;;  %v78_v33 = vsub.s32 1, %v73_v30 }
  0x19   :  { %v630_v26 = vld [vmem:[%s896_s3 + $0x30] sm:$0xff]   ;;  %v631_v27 = vld [vmem:[%s896_s3 + $0x78] sm:$0xff]   ;;  %v38_v32 = vld [vmem:[%s895_s2] sm:$0x3] }
  0x1a   :  { %521 = vmatmul.mubr.msk.bf16.gmra.mrb[4].mxu0 %vm142_vm0, %v614_v12  ;;  %v632_v28 = vld [vmem:[%s896_s3 + $0x38] sm:$0xff]   ;;  %v814_v34 = vrot.slane %v38_v32, %v74_v31  ;;  %v816_v35 = vrot.slane %v38_v32, %v78_v33 }
  0x1b   :  { %207 = vmatprep.mubr.bf16.mxu0 %v689_v2  ;;  %546 = vmatpush3.bf16.msra.mxu0 %v622_v18 }
  0x1c   :  { %591 = vmatpush3.bf16.msra.mxu1 %v622_v18  ;;  %547 = vmatprep.subr.bf16.mxu0 %v623_v19 }
  0x1d   :  { %584 = vmatprep.subr.bf16.mxu1 %v623_v19 }
  0x1f   :  { %548 = vmatpush3.bf16.msra.mxu0 %v624_v20 }
  0x20   :  { %592 = vmatpush3.bf16.msra.mxu1 %v624_v20  ;;  %549 = vmatprep.subr.bf16.mxu0 %v625_v21 }
  0x21   :  { %585 = vmatprep.subr.bf16.mxu1 %v625_v21 }
  0x22   :  { %522 = vmatmul.mubr.msk.bf16.gmra.mrb[8].mxu0 %vm142_vm0, %v615_v13 }
  0x23   :  { %217 = vmatprep.mubr.bf16.mxu0 %v689_v2  ;;  %550 = vmatpush3.bf16.msra.mxu0 %v626_v22 }
  0x24   :  { %593 = vmatpush3.bf16.msra.mxu1 %v626_v22  ;;  %551 = vmatprep.subr.bf16.mxu0 %v627_v23 }
  0x25   :  { %586 = vmatprep.subr.bf16.mxu1 %v627_v23 }
  0x27   :  { %552 = vmatpush3.bf16.msra.mxu0 %v628_v24 }
  0x28   :  { %594 = vmatpush3.bf16.msra.mxu1 %v628_v24  ;;  %553 = vmatprep.subr.bf16.mxu0 %v629_v25 }
  0x29   :  { %587 = vmatprep.subr.bf16.mxu1 %v629_v25 }
  0x2a   :  { %523 = vmatmul.mubr.msk.bf16.gmra.mrb[12].mxu0 %vm142_vm0, %v616_v14 }
  0x2b   :  { %554 = vmatpush3.bf16.msra.mxu0 %v630_v26 }
  0x2c   :  { %595 = vmatpush3.bf16.msra.mxu1 %v630_v26  ;;  %555 = vmatprep.subr.bf16.mxu0 %v631_v27 }
  0x2d   :  { %588 = vmatprep.subr.bf16.mxu1 %v631_v27 }
  0x2f   :  { %556 = vmatpush3.bf16.msra.mxu0 %v632_v28 }
  0x30   :  { %596 = vmatpush3.bf16.msra.mxu1 %v632_v28 }
  0xe5   :  { %v189_v36 = vpop.f32.mrb[0].mxu0 }
  0xe6   :  { %v190_v37 = vadd.f32 %v189_v36, %v814_v34  ;;  %v191_v38 = vpop.f32.mrb[1].mxu0 }
  0xe7   :  { %v192_v39 = vadd.f32 %v191_v38, %v816_v35  ;;  %v193_v40 = vpop.f32.mrb[2].mxu0 }
  0xe8   :  { %v228_v41 = vmul.f32 0.851, %v190_v37  ;;  %v194_v42 = vadd.f32 %v193_v40, %v814_v34  ;;  %v195_v43 = vpop.f32.mrb[3].mxu0 }
  0xe9   :  { %v229_v44 = vmul.f32 0.851, %v192_v39  ;;  %v196_v45 = vadd.f32 %v195_v43, %v816_v35 }
  0xea   :  { %633 = vtanh.f32 %v228_v41  ;;  %v230_v46 = vmul.f32 0.851, %v194_v42 }
  0xeb   :  { %635 = vtanh.f32 %v229_v44  ;;  %v231_v47 = vmul.f32 0.851, %v196_v45 }
  0xec   :  { %637 = vtanh.f32 %v230_v46 }
  0xed   :  { %639 = vtanh.f32 %v231_v47  ;;  %v199_v48 = vpop.f32.mrb[4].mxu0 }
  0xee   :  { %v823_v49 = vadd.f32 %v199_v48, %v814_v34  ;;  %v201_v50 = vpop.f32.mrb[5].mxu0 }
  0xef   :  { %v826_v51 = vadd.f32 %v201_v50, %v816_v35  ;;  %v203_v52 = vpop.f32.mrb[6].mxu0 }
  0xf0   :  { %v232_v53 = vmul.f32 0.851, %v823_v49  ;;  %v830_v54 = vadd.f32 %v203_v52, %v814_v34  ;;  %v205_v55 = vpop.f32.mrb[7].mxu0 }
  0xf1   :  { %v233_v56 = vmul.f32 0.851, %v826_v51  ;;  %v834_v57 = vadd.f32 %v205_v55, %v816_v35 }
  0xf2   :  { %641 = vtanh.f32 %v232_v53  ;;  %v234_v58 = vmul.f32 0.851, %v830_v54 }
  0xf3   :  { %643 = vtanh.f32 %v233_v56  ;;  %v235_v59 = vmul.f32 0.851, %v834_v57 }
  0xf4   :  { %v634_v60 = vpop.eup %633  ;;  %645 = vtanh.f32 %v234_v58 }
  0xf5   :  { %v636_v61 = vpop.eup %635  ;;  %v260_v62 = vmul.f32 0.5, %v634_v60  ;;  %647 = vtanh.f32 %v235_v59  ;;  %v209_v63 = vpop.f32.mrb[8].mxu0 }
  0xf6   :  { %v638_v0 = vpop.eup %637  ;;  %v261_v1 = vmul.f32 0.5, %v636_v61  ;;  %v839_v2 = vadd.f32 %v209_v63, %v814_v34  ;;  %v211_v3 = vpop.f32.mrb[9].mxu0 }
  0xf7   :  { %v640_v4 = vpop.eup %639  ;;  %v276_v5 = vadd.f32 0.5, %v260_v62  ;;  %v262_v6 = vmul.f32 0.5, %v638_v0  ;;  %v842_v7 = vadd.f32 %v211_v3, %v816_v35  ;;  %v213_v8 = vpop.f32.mrb[10].mxu0 }
  0xf8   :  { %v277_v9 = vadd.f32 0.5, %v261_v1  ;;  %v263_v10 = vmul.f32 0.5, %v640_v4  ;;  %v236_v11 = vmul.f32 0.851, %v839_v2  ;;  %v846_v12 = vadd.f32 %v213_v8, %v814_v34  ;;  %v215_v13 = vpop.f32.mrb[11].mxu0 }
  0xf9   :  { %v278_v14 = vadd.f32 0.5, %v262_v6  ;;  %v237_v15 = vmul.f32 0.851, %v842_v7  ;;  %v850_v16 = vadd.f32 %v215_v13, %v816_v35  ;;  %v292_v19 = vmul.f32 %v276_v5, %v190_v37 }
  0xfa   :  { %v279_v17 = vadd.f32 0.5, %v263_v10  ;;  %649 = vtanh.f32 %v236_v11  ;;  %v238_v18 = vmul.f32 0.851, %v846_v12  ;;  %v293_v23 = vmul.f32 %v277_v9, %v192_v39 }
  0xfb   :  { %v294_v20 = vmul.f32 %v278_v14, %v194_v42  ;;  %651 = vtanh.f32 %v237_v15  ;;  %v239_v21 = vmul.f32 0.851, %v850_v16 }
  0xfc   :  { %v642_v22 = vpop.eup %641  ;;  %v295_v24 = vmul.f32 %v279_v17, %v196_v45  ;;  %653 = vtanh.f32 %v238_v18 }
  0xfd   :  { %v644_v25 = vpop.eup %643  ;;  %v308_v26 = vpack.c.bf16 %v294_v20, %v292_v19  ;;  %v264_v27 = vmul.f32 0.5, %v642_v22  ;;  %655 = vtanh.f32 %v239_v21  ;;  %v219_v28 = vpop.f32.mrb[12].mxu0 }
  0xfe   :  { %v646_v29 = vpop.eup %645  ;;  %v855_v30 = vadd.f32 %v219_v28, %v814_v34  ;;  %v221_v31 = vpop.f32.mrb[13].mxu0  ;;  %v309_v32 = vpack.c.bf16 %v295_v24, %v293_v23  ;;  %v265_v33 = vmul.f32 0.5, %v644_v25 }
  0xff   :  { %v648_v36 = vpop.eup %647  ;;  %v280_v37 = vadd.f32 0.5, %v264_v27  ;;  %v266_v38 = vmul.f32 0.5, %v646_v29  ;;  %v222_v40 = vadd.f32 %v221_v31, %v816_v35  ;;  %v223_v39 = vpop.f32.mrb[14].mxu0  ;;  %v524_v29 = vld [vmem:[%s897_s4] ss:$0 sm:$0xff]  ;;  %s690_s4 = smov [#allocation2]  }
 0x100   :  { %v240_v41 = vmul.f32 0.851, %v855_v30  ;;  %v224_v42 = vadd.f32 %v223_v39, %v814_v34  ;;  %v225_v43 = vpop.f32.mrb[15].mxu0  ;;  %451 = vmatprep.mubr.bf16.mxu0 %v309_v32  ;;  %v267_v44 = vmul.f32 0.5, %v648_v36  ;;  %v281_v45 = vadd.f32 0.5, %v265_v33  ;;  %s497_s23 = sshll.u32 %s690_s4, 4  ;;  %s498_s23 = int_to_ptr.vmem [resolvable:$true] %s497_s23 }
 0x101   :  { %v282_v46 = vadd.f32 0.5, %v266_v38  ;;  %v241_v47 = vmul.f32 0.851, %v222_v40  ;;  %v226_v48 = vadd.f32 %v225_v43, %v816_v35  ;;  %452 = vmatmul.mubr.bf16.vlgmr.msra.gmra.mrb[16].mxu0 %v308_v26  ;;  %v296_v53 = vmul.f32 %v280_v37, %v823_v49  ;;  %s665_s24 = scalar_lea.vmem %s498_s23, 1024  ;;  %p670_p1 = scmp.lt.s32.totalorder %s498_s23, %s498_s23 }
 0x102   :  { %657 = vtanh.f32 %v240_v41  ;;  %v242_v50 = vmul.f32 0.851, %v224_v42  ;;  %v283_v52 = vadd.f32 0.5, %v267_v44  ;;  %v297_v34 = vmul.f32 %v281_v45, %v826_v51  ;;  %p666_p0 = scmp.ne.s32.totalorder %s498_s23, %s665_s24  ;;  %p671_p2 = scmp.lt.s32.totalorder %s665_s24, %s665_s24 }
 0x103   :  { %v298_v55 = vmul.f32 %v282_v46, %v830_v54  ;;  %659 = vtanh.f32 %v241_v47  ;;  %v243_v56 = vmul.f32 0.851, %v226_v48 }
 0x104   :  { %v650_v58 = vpop.eup %649  ;;  %661 = vtanh.f32 %v242_v50  ;;  %v299_v59 = vmul.f32 %v283_v52, %v834_v57  ;;  %p672_p3 = por %p671_p2, %p670_p1 }
 0x105   :  { %v652_v60 = vpop.eup %651  ;;  %v268_v61 = vmul.f32 0.5, %v650_v58  ;;  %663 = vtanh.f32 %v243_v56  ;;  %v310_v35 = vpack.c.bf16 %v298_v55, %v296_v53 }
 0x106   :  { %v654_v62 = vpop.eup %653  ;;  %v269_v63 = vmul.f32 0.5, %v652_v60  ;;  %v311_v0 = vpack.c.bf16 %v299_v59, %v297_v34  ;;  %p673_p4 = pnand %p672_p3, %p666_p0 }
 0x107   :  { %v656_v1 = vpop.eup %655  ;;  %v284_v3 = vadd.f32 0.5, %v268_v61  ;;  %v270_v49 = vmul.f32 0.5, %v654_v62 }
 0x108   :  { %v285_v4 = vadd.f32 0.5, %v269_v63  ;;  %v271_v54 = vmul.f32 0.5, %v656_v1  ;;  %459 = vmatprep.mubr.bf16.mxu1 %v311_v0 }
 0x109   :  { %v286_v5 = vadd.f32 0.5, %v270_v49  ;;  %460 = vmatmul.mubr.bf16.vlgmr.msra.gmra.mrb[0].mxu1 %v310_v35  ;;  %v300_v51 = vmul.f32 %v284_v3, %v839_v2 }
 0x10a   :  { %v287_v6 = vadd.f32 0.5, %v271_v54  ;;  %v301_v9 = vmul.f32 %v285_v4, %v842_v7 }
 0x10b   :  { %v302_v57 = vmul.f32 %v286_v5, %v846_v12 }
 0x10c   :  { %v658_v8 = vpop.eup %657  ;;  %v303_v10 = vmul.f32 %v287_v6, %v850_v16 }
 0x10d   :  { %v660_v11 = vpop.eup %659  ;;  %v272_v13 = vmul.f32 0.5, %v658_v8  ;;  %v312_v14 = vpack.c.bf16 %v302_v57, %v300_v51 }
 0x10e   :  { %v662_v15 = vpop.eup %661  ;;  %v273_v17 = vmul.f32 0.5, %v660_v11  ;;  %v313_v18 = vpack.c.bf16 %v303_v10, %v301_v9 }
 0x10f   :  { %v664_v19 = vpop.eup %663  ;;  %v288_v20 = vadd.f32 0.5, %v272_v13  ;;  %v274_v21 = vmul.f32 0.5, %v662_v15 }
 0x110   :  { %v289_v22 = vadd.f32 0.5, %v273_v17  ;;  %v275_v23 = vmul.f32 0.5, %v664_v19  ;;  %467 = vmatprep.mubr.bf16.mxu1 %v313_v18 }
 0x111   :  { %v290_v2 = vadd.f32 0.5, %v274_v21  ;;  %468 = vmatmul.mubr.bf16.gmra.mrb[4].mxu1 %v312_v14  ;;  %v304_v24 = vmul.f32 %v288_v20, %v855_v30 }
 0x112   :  { %v291_v12 = vadd.f32 0.5, %v275_v23  ;;  %v305_v25 = vmul.f32 %v289_v22, %v222_v40 }
 0x113   :  { %v306_v7 = vmul.f32 %v290_v2, %v224_v42 }
 0x114   :  { %v307_v16 = vmul.f32 %v291_v12, %v226_v48 }
 0x115   :  { %v314_v26 = vpack.c.bf16 %v306_v7, %v304_v24 }
 0x116   :  { %v315_v27 = vpack.c.bf16 %v307_v16, %v305_v25 }
 0x118   :  { %475 = vmatprep.mubr.bf16.mxu1 %v315_v27 }
 0x119   :  { %476 = vmatmul.mubr.bf16.gmra.mrb[8].mxu1 %v314_v26 }
 0x1d4   :  { %v557_v28 = vpop.f32.mrb[16].mxu0 }
 0x1d5   :  { %v558_v31 = vpop.f32.mrb[17].mxu0 }
 0x1d6   :  { %v559_v32 = vadd.f32 %v558_v31, %v557_v28  ;;  %v560_v33 = vpop.f32.mrb[18].mxu0 }
 0x1d7   :  { %v561_v36 = vpop.f32.mrb[19].mxu0 }
 0x1d8   :  { %v454_v37 = vadd.f32 %v559_v32, %v524_v29  ;;  %v562_v38 = vadd.f32 %v561_v36, %v560_v33 }
 0x1da   :  { %484 = vst.msk [vmem:[#allocation2] sm:$0xff] %vm142_vm0, %v454_v37  ;;  %v457_v30 = vadd.f32 %v562_v38, %v524_v29 }
 0x1dc   :  { %485 = vst.msk [vmem:[#allocation2 + $0x8] sm:$0xff] %vm142_vm0, %v457_v30  ;;  %v563_v40 = vpop.f32.mrb[0].mxu1 }
 0x1dd   :  { %v564_v39 = vpop.f32.mrb[1].mxu1 }
 0x1de   :  { %v565_v41 = vadd.f32 %v564_v39, %v563_v40  ;;  %v566_v42 = vpop.f32.mrb[2].mxu1 }
 0x1df   :  { %v567_v43 = vpop.f32.mrb[3].mxu1 }
 0x1e0   :  { %v462_v44 = vadd.f32 %v565_v41, %v524_v29  ;;  %v568_v45 = vadd.f32 %v567_v43, %v566_v42 }
 0x1e2   :  { %486 = vst.msk [vmem:[#allocation2 + $0x10] sm:$0xff] %vm142_vm0, %v462_v44  ;;  %v465_v46 = vadd.f32 %v568_v45, %v524_v29 }
 0x1e4   :  { %487 = vst.msk [vmem:[#allocation2 + $0x18] sm:$0xff] %vm142_vm0, %v465_v46  ;;  %v569_v47 = vpop.f32.mrb[4].mxu1 }
 0x1e5   :  { %v570_v48 = vpop.f32.mrb[5].mxu1 }
 0x1e6   :  { %v571_v50 = vadd.f32 %v570_v48, %v569_v47  ;;  %v572_v52 = vpop.f32.mrb[6].mxu1 }
 0x1e7   :  { %v573_v53 = vpop.f32.mrb[7].mxu1 }
 0x1e8   :  { %v470_v55 = vadd.f32 %v571_v50, %v524_v29  ;;  %v574_v56 = vadd.f32 %v573_v53, %v572_v52 }
 0x1ea   :  { %488 = vst.msk [vmem:[#allocation2 + $0x20] sm:$0xff] %vm142_vm0, %v470_v55  ;;  %v473_v58 = vadd.f32 %v574_v56, %v524_v29 }
 0x1ec   :  { %489 = vst.msk [vmem:[#allocation2 + $0x28] sm:$0xff] %vm142_vm0, %v473_v58  ;;  %v575_v34 = vpop.f32.mrb[8].mxu1 }
 0x1ed   :  { %v576_v59 = vpop.f32.mrb[9].mxu1 }
 0x1ee   :  { %v577_v60 = vadd.f32 %v576_v59, %v575_v34  ;;  %v578_v61 = vpop.f32.mrb[10].mxu1 }
 0x1ef   :  { %v579_v35 = vpop.f32.mrb[11].mxu1 }
 0x1f0   :  { %v478_v62 = vadd.f32 %v577_v60, %v524_v29  ;;  %v580_v63 = vadd.f32 %v579_v35, %v578_v61 }
 0x1f2   :  { %490 = vst.msk [vmem:[#allocation2 + $0x30] sm:$0xff] %vm142_vm0, %v478_v62  ;;  %v481_v0 = vadd.f32 %v580_v63, %v524_v29 }
 0x1f4   :  { %491 = vst.msk [vmem:[#allocation2 + $0x38] sm:$0xff] %vm142_vm0, %v481_v0 }
 0x1f5   :  { %676 = shalt.err (!%p673_p4)
}
 0x1f6   :  { %s677_s0 = scalar_lea.hbm %s898_s5, 1024 }
 0x1f7   :  { %p678_p5 = scmp.ne.s32.totalorder %s898_s5, %s677_s0  ;;  %p681_p6 = scmp.lt.u32.totalorder %s677_s0, %s898_s5 }
 0x1f9   :  { %p683_p7 = pnand %p681_p6, %p678_p5 }
 0x1fb   :  { %686 = shalt.err (!%p683_p7)
}
 0x1fc   :  { %s691_s6 = smov 128   ;;  %s692_s7 = smov 8  }
 0x1fd   :  { %503 = dma.vmem_to_hbm [thread:$0]  %s498_s23, 1024, %s898_s5, [#allocation3], %s691_s6, %s691_s6, %s692_s7  }
 0x1fe   :  { %687 = dma.done.wait [#allocation3], 1024  }
 0x1ff   :  { %688 = vsyncadd [#allocation3], 4294966272 }
 0x200   :  { %507 = vsyncpa [#allocation3], 1 }

// kernel: tpu_custom_call.1
= control target key start
LH: loop header
LB: loop body
LE: loop exit
PB: predicated region body
PF: predicated region fallthrough
CT: control target
= control target key end

     0   :  { %v689_v2 = vmov 0   ;;  %vm142_vm0 = vcmask 523264   ;;  %s893_s0 = inlined_call_operand.vmem [shape: bf16[64,64], index: 0, kind: input, shape index: {}]   ;;  %s894_s1 = inlined_call_operand.vmem [shape: bf16[64,256], index: 1, kind: input, shape index: {}]   ;;  %s895_s2 = inlined_call_operand.vmem [shape: f32[1,256], index: 2, kind: input, shape index: {}]   ;;  %s896_s3 = inlined_call_operand.vmem [shape: bf16[256,64], index: 3, kind: input, shape index: {}]   ;;  %s897_s4 = inlined_call_operand.vmem [shape: f32[1,64], index: 4, kind: input, shape index: {}]   ;;  %s898_s5 = inlined_call_operand.hbm [shape: f32[64,64], index: 5, kind: output, shape index: {}]  }
   0x1   :  { %v601_v0 = vld [vmem:[%s894_s1 + $0x4] ss:$8 sps:$4 sm:$0xff]   ;;  %v603_v1 = vld [vmem:[%s894_s1] ss:$8 sps:$4 sm:$0xff]   ;;  %187 = vmatprep.mubr.bf16.mxu0 %v689_v2  ;;  %v604_v3 = vld [vmem:[%s894_s1 + $0x14] ss:$8 sps:$4 sm:$0xff]  }
   0x2   :  { %155 = vmatprep.subr.bf16.mxu0 %v601_v0  ;;  %v606_v4 = vld [vmem:[%s894_s1 + $0x10] ss:$8 sps:$4 sm:$0xff]   ;;  %v607_v5 = vld [vmem:[%s894_s1 + $0x24] ss:$8 sps:$4 sm:$0xff]   ;;  %v609_v6 = vld [vmem:[%s894_s1 + $0x20] ss:$8 sps:$4 sm:$0xff]  }
   0x3   :  { %156 = vmatpush1.bf16.msra.mxu0 %v603_v1  ;;  %v610_v7 = vld [vmem:[%s894_s1 + $0x34] ss:$8 sps:$4 sm:$0xff]   ;;  %v617_v8 = vld [vmem:[%s896_s3 + $0x40] sm:$0xff]   ;;  %v612_v9 = vld [vmem:[%s894_s1 + $0x30] ss:$8 sps:$4 sm:$0xff]  }
   0x4   :  { %157 = vmatprep.subr.bf16.mxu0 %v604_v3  ;;  %v618_v10 = vld [vmem:[%s896_s3] sm:$0xff]   ;;  %581 = vmatprep.subr.bf16.mxu1 %v617_v8 }
   0x5   :  { %v613_v11 = vld [vmem:[%s893_s0] sm:$0xff]   ;;  %589 = vmatpush3.bf16.msra.mxu1 %v618_v10 }
   0x7   :  { %158 = vmatpush1.bf16.msra.mxu0 %v606_v4 }
   0x8   :  { %159 = vmatprep.subr.bf16.mxu0 %v607_v5 }
   0xb   :  { %160 = vmatpush1.bf16.msra.mxu0 %v609_v6 }
   0xc   :  { %161 = vmatprep.subr.bf16.mxu0 %v610_v7 }
   0xf   :  { %162 = vmatpush1.bf16.msra.mxu0 %v612_v9 }
  0x10   :  { %541 = vmatprep.subr.bf16.mxu0 %v617_v8 }
  0x12   :  { %520 = vmatmul.mubr.msk.bf16.vlgmr.msra.gmra.mrb[0].mxu0 %vm142_vm0, %v613_v11 }
  0x13   :  { %197 = vmatprep.mubr.bf16.mxu0 %v689_v2  ;;  %542 = vmatpush3.bf16.msra.mxu0 %v618_v10 }
  0x14   :  { %10 = vsyncpa [#allocation3], 0  ;;  %v614_v12 = vld [vmem:[%s893_s0 + $0x8] sm:$0xff]   ;;  %v615_v13 = vld [vmem:[%s893_s0 + $0x10] sm:$0xff]   ;;  %v72_v29 = vlaneseq }
  0x15   :  { %v616_v14 = vld [vmem:[%s893_s0 + $0x18] sm:$0xff]   ;;  %v619_v15 = vld [vmem:[%s896_s3 + $0x48] sm:$0xff]   ;;  %v621_v17 = vld [vmem:[%s896_s3 + $0x50] sm:$0xff]  }
  0x16   :  { %v620_v16 = vld [vmem:[%s896_s3 + $0x8] sm:$0xff]   ;;  %543 = vmatprep.subr.bf16.mxu0 %v619_v15  ;;  %582 = vmatprep.subr.bf16.mxu1 %v619_v15  ;;  %v622_v18 = vld [vmem:[%s896_s3 + $0x10] sm:$0xff]   ;;  %v623_v19 = vld [vmem:[%s896_s3 + $0x58] sm:$0xff]   ;;  %v73_v30 = vshrl.u32 %v72_v29, 7 }
  0x17   :  { %544 = vmatpush3.bf16.msra.mxu0 %v620_v16  ;;  %590 = vmatpush3.bf16.msra.mxu1 %v620_v16  ;;  %v624_v20 = vld [vmem:[%s896_s3 + $0x18] sm:$0xff]   ;;  %v625_v21 = vld [vmem:[%s896_s3 + $0x60] sm:$0xff]   ;;  %v627_v23 = vld [vmem:[%s896_s3 + $0x68] sm:$0xff]  }
  0x18   :  { %545 = vmatprep.subr.bf16.mxu0 %v621_v17  ;;  %583 = vmatprep.subr.bf16.mxu1 %v621_v17  ;;  %v626_v22 = vld [vmem:[%s896_s3 + $0x20] sm:$0xff]   ;;  %v628_v24 = vld [vmem:[%s896_s3 + $0x28] sm:$0xff]   ;;  %v629_v25 = vld [vmem:[%s896_s3 + $0x70] sm:$0xff]   ;;  %v74_v31 = vsub.s32 0, %v73_v30  ;;  %v78_v33 = vsub.s32 1, %v73_v30 }
  0x19   :  { %v630_v26 = vld [vmem:[%s896_s3 + $0x30] sm:$0xff]   ;;  %v631_v27 = vld [vmem:[%s896_s3 + $0x78] sm:$0xff]   ;;  %v38_v32 = vld [vmem:[%s895_s2] sm:$0x3] }
  0x1a   :  { %521 = vmatmul.mubr.msk.bf16.gmra.mrb[4].mxu0 %vm142_vm0, %v614_v12  ;;  %v632_v28 = vld [vmem:[%s896_s3 + $0x38] sm:$0xff]   ;;  %v814_v34 = vrot.slane %v38_v32, %v74_v31  ;;  %v816_v35 = vrot.slane %v38_v32, %v78_v33 }
  0x1b   :  { %207 = vmatprep.mubr.bf16.mxu0 %v689_v2  ;;  %546 = vmatpush3.bf16.msra.mxu0 %v622_v18 }
  0x1c   :  { %591 = vmatpush3.bf16.msra.mxu1 %v622_v18  ;;  %547 = vmatprep.subr.bf16.mxu0 %v623_v19 }
  0x1d   :  { %584 = vmatprep.subr.bf16.mxu1 %v623_v19 }
  0x1f   :  { %548 = vmatpush3.bf16.msra.mxu0 %v624_v20 }
  0x20   :  { %592 = vmatpush3.bf16.msra.mxu1 %v624_v20  ;;  %549 = vmatprep.subr.bf16.mxu0 %v625_v21 }
  0x21   :  { %585 = vmatprep.subr.bf16.mxu1 %v625_v21 }
  0x22   :  { %522 = vmatmul.mubr.msk.bf16.gmra.mrb[8].mxu0 %vm142_vm0, %v615_v13 }
  0x23   :  { %217 = vmatprep.mubr.bf16.mxu0 %v689_v2  ;;  %550 = vmatpush3.bf16.msra.mxu0 %v626_v22 }
  0x24   :  { %593 = vmatpush3.bf16.msra.mxu1 %v626_v22  ;;  %551 = vmatprep.subr.bf16.mxu0 %v627_v23 }
  0x25   :  { %586 = vmatprep.subr.bf16.mxu1 %v627_v23 }
  0x27   :  { %552 = vmatpush3.bf16.msra.mxu0 %v628_v24 }
  0x28   :  { %594 = vmatpush3.bf16.msra.mxu1 %v628_v24  ;;  %553 = vmatprep.subr.bf16.mxu0 %v629_v25 }
  0x29   :  { %587 = vmatprep.subr.bf16.mxu1 %v629_v25 }
  0x2a   :  { %523 = vmatmul.mubr.msk.bf16.gmra.mrb[12].mxu0 %vm142_vm0, %v616_v14 }
  0x2b   :  { %554 = vmatpush3.bf16.msra.mxu0 %v630_v26 }
  0x2c   :  { %595 = vmatpush3.bf16.msra.mxu1 %v630_v26  ;;  %555 = vmatprep.subr.bf16.mxu0 %v631_v27 }
  0x2d   :  { %588 = vmatprep.subr.bf16.mxu1 %v631_v27 }
  0x2f   :  { %556 = vmatpush3.bf16.msra.mxu0 %v632_v28 }
  0x30   :  { %596 = vmatpush3.bf16.msra.mxu1 %v632_v28 }
  0xe5   :  { %v189_v36 = vpop.f32.mrb[0].mxu0 }
  0xe6   :  { %v190_v37 = vadd.f32 %v189_v36, %v814_v34  ;;  %v191_v38 = vpop.f32.mrb[1].mxu0 }
  0xe7   :  { %v192_v39 = vadd.f32 %v191_v38, %v816_v35  ;;  %v193_v40 = vpop.f32.mrb[2].mxu0 }
  0xe8   :  { %v228_v41 = vmul.f32 0.851, %v190_v37  ;;  %v194_v42 = vadd.f32 %v193_v40, %v814_v34  ;;  %v195_v43 = vpop.f32.mrb[3].mxu0 }
  0xe9   :  { %v229_v44 = vmul.f32 0.851, %v192_v39  ;;  %v196_v45 = vadd.f32 %v195_v43, %v816_v35 }
  0xea   :  { %633 = vtanh.f32 %v228_v41  ;;  %v230_v46 = vmul.f32 0.851, %v194_v42 }
  0xeb   :  { %635 = vtanh.f32 %v229_v44  ;;  %v231_v47 = vmul.f32 0.851, %v196_v45 }
  0xec   :  { %637 = vtanh.f32 %v230_v46 }
  0xed   :  { %639 = vtanh.f32 %v231_v47  ;;  %v199_v48 = vpop.f32.mrb[4].mxu0 }
  0xee   :  { %v823_v49 = vadd.f32 %v199_v48, %v814_v34  ;;  %v201_v50 = vpop.f32.mrb[5].mxu0 }
  0xef   :  { %v826_v51 = vadd.f32 %v201_v50, %v816_v35  ;;  %v203_v52 = vpop.f32.mrb[6].mxu0 }
  0xf0   :  { %v232_v53 = vmul.f32 0.851, %v823_v49  ;;  %v830_v54 = vadd.f32 %v203_v52, %v814_v34  ;;  %v205_v55 = vpop.f32.mrb[7].mxu0 }
  0xf1   :  { %v233_v56 = vmul.f32 0.851, %v826_v51  ;;  %v834_v57 = vadd.f32 %v205_v55, %v816_v35 }
  0xf2   :  { %641 = vtanh.f32 %v232_v53  ;;  %v234_v58 = vmul.f32 0.851, %v830_v54 }
  0xf3   :  { %643 = vtanh.f32 %v233_v56  ;;  %v235_v59 = vmul.f32 0.851, %v834_v57 }
  0xf4   :  { %v634_v60 = vpop.eup %633  ;;  %645 = vtanh.f32 %v234_v58 }
  0xf5   :  { %v636_v61 = vpop.eup %635  ;;  %v260_v62 = vmul.f32 0.5, %v634_v60  ;;  %647 = vtanh.f32 %v235_v59  ;;  %v209_v63 = vpop.f32.mrb[8].mxu0 }
  0xf6   :  { %v638_v0 = vpop.eup %637  ;;  %v261_v1 = vmul.f32 0.5, %v636_v61  ;;  %v839_v2 = vadd.f32 %v209_v63, %v814_v34  ;;  %v211_v3 = vpop.f32.mrb[9].mxu0 }
  0xf7   :  { %v640_v4 = vpop.eup %639  ;;  %v276_v5 = vadd.f32 0.5, %v260_v62  ;;  %v262_v6 = vmul.f32 0.5, %v638_v0  ;;  %v842_v7 = vadd.f32 %v211_v3, %v816_v35  ;;  %v213_v8 = vpop.f32.mrb[10].mxu0 }
  0xf8   :  { %v277_v9 = vadd.f32 0.5, %v261_v1  ;;  %v263_v10 = vmul.f32 0.5, %v640_v4  ;;  %v236_v11 = vmul.f32 0.851, %v839_v2  ;;  %v846_v12 = vadd.f32 %v213_v8, %v814_v34  ;;  %v215_v13 = vpop.f32.mrb[11].mxu0 }
  0xf9   :  { %v278_v14 = vadd.f32 0.5, %v262_v6  ;;  %v237_v15 = vmul.f32 0.851, %v842_v7  ;;  %v850_v16 = vadd.f32 %v215_v13, %v816_v35  ;;  %v292_v19 = vmul.f32 %v276_v5, %v190_v37 }
  0xfa   :  { %v279_v17 = vadd.f32 0.5, %v263_v10  ;;  %649 = vtanh.f32 %v236_v11  ;;  %v238_v18 = vmul.f32 0.851, %v846_v12  ;;  %v293_v23 = vmul.f32 %v277_v9, %v192_v39 }
  0xfb   :  { %v294_v20 = vmul.f32 %v278_v14, %v194_v42  ;;  %651 = vtanh.f32 %v237_v15  ;;  %v239_v21 = vmul.f32 0.851, %v850_v16 }
  0xfc   :  { %v642_v22 = vpop.eup %641  ;;  %v295_v24 = vmul.f32 %v279_v17, %v196_v45  ;;  %653 = vtanh.f32 %v238_v18 }
  0xfd   :  { %v644_v25 = vpop.eup %643  ;;  %v308_v26 = vpack.c.bf16 %v294_v20, %v292_v19  ;;  %v264_v27 = vmul.f32 0.5, %v642_v22  ;;  %655 = vtanh.f32 %v239_v21  ;;  %v219_v28 = vpop.f32.mrb[12].mxu0 }
  0xfe   :  { %v646_v29 = vpop.eup %645  ;;  %v855_v30 = vadd.f32 %v219_v28, %v814_v34  ;;  %v221_v31 = vpop.f32.mrb[13].mxu0  ;;  %v309_v32 = vpack.c.bf16 %v295_v24, %v293_v23  ;;  %v265_v33 = vmul.f32 0.5, %v644_v25 }
  0xff   :  { %v648_v36 = vpop.eup %647  ;;  %v280_v37 = vadd.f32 0.5, %v264_v27  ;;  %v266_v38 = vmul.f32 0.5, %v646_v29  ;;  %v222_v40 = vadd.f32 %v221_v31, %v816_v35  ;;  %v223_v39 = vpop.f32.mrb[14].mxu0  ;;  %v524_v29 = vld [vmem:[%s897_s4] ss:$0 sm:$0xff]  ;;  %s690_s4 = smov [#allocation2]  }
 0x100   :  { %v240_v41 = vmul.f32 0.851, %v855_v30  ;;  %v224_v42 = vadd.f32 %v223_v39, %v814_v34  ;;  %v225_v43 = vpop.f32.mrb[15].mxu0  ;;  %451 = vmatprep.mubr.bf16.mxu0 %v309_v32  ;;  %v267_v44 = vmul.f32 0.5, %v648_v36  ;;  %v281_v45 = vadd.f32 0.5, %v265_v33  ;;  %s497_s23 = sshll.u32 %s690_s4, 4  ;;  %s498_s23 = int_to_ptr.vmem [resolvable:$true] %s497_s23 }
 0x101   :  { %v282_v46 = vadd.f32 0.5, %v266_v38  ;;  %v241_v47 = vmul.f32 0.851, %v222_v40  ;;  %v226_v48 = vadd.f32 %v225_v43, %v816_v35  ;;  %452 = vmatmul.mubr.bf16.vlgmr.msra.gmra.mrb[16].mxu0 %v308_v26  ;;  %v296_v53 = vmul.f32 %v280_v37, %v823_v49  ;;  %s665_s24 = scalar_lea.vmem %s498_s23, 1024  ;;  %p670_p1 = scmp.lt.s32.totalorder %s498_s23, %s498_s23 }
 0x102   :  { %657 = vtanh.f32 %v240_v41  ;;  %v242_v50 = vmul.f32 0.851, %v224_v42  ;;  %v283_v52 = vadd.f32 0.5, %v267_v44  ;;  %v297_v34 = vmul.f32 %v281_v45, %v826_v51  ;;  %p666_p0 = scmp.ne.s32.totalorder %s498_s23, %s665_s24  ;;  %p671_p2 = scmp.lt.s32.totalorder %s665_s24, %s665_s24 }
 0x103   :  { %v298_v55 = vmul.f32 %v282_v46, %v830_v54  ;;  %659 = vtanh.f32 %v241_v47  ;;  %v243_v56 = vmul.f32 0.851, %v226_v48 }
 0x104   :  { %v650_v58 = vpop.eup %649  ;;  %661 = vtanh.f32 %v242_v50  ;;  %v299_v59 = vmul.f32 %v283_v52, %v834_v57  ;;  %p672_p3 = por %p671_p2, %p670_p1 }
 0x105   :  { %v652_v60 = vpop.eup %651  ;;  %v268_v61 = vmul.f32 0.5, %v650_v58  ;;  %663 = vtanh.f32 %v243_v56  ;;  %v310_v35 = vpack.c.bf16 %v298_v55, %v296_v53 }
 0x106   :  { %v654_v62 = vpop.eup %653  ;;  %v269_v63 = vmul.f32 0.5, %v652_v60  ;;  %v311_v0 = vpack.c.bf16 %v299_v59, %v297_v34  ;;  %p673_p4 = pnand %p672_p3, %p666_p0 }
 0x107   :  { %v656_v1 = vpop.eup %655  ;;  %v284_v3 = vadd.f32 0.5, %v268_v61  ;;  %v270_v49 = vmul.f32 0.5, %v654_v62 }
 0x108   :  { %v285_v4 = vadd.f32 0.5, %v269_v63  ;;  %v271_v54 = vmul.f32 0.5, %v656_v1  ;;  %459 = vmatprep.mubr.bf16.mxu1 %v311_v0 }
 0x109   :  { %v286_v5 = vadd.f32 0.5, %v270_v49  ;;  %460 = vmatmul.mubr.bf16.vlgmr.msra.gmra.mrb[0].mxu1 %v310_v35  ;;  %v300_v51 = vmul.f32 %v284_v3, %v839_v2 }
 0x10a   :  { %v287_v6 = vadd.f32 0.5, %v271_v54  ;;  %v301_v9 = vmul.f32 %v285_v4, %v842_v7 }
 0x10b   :  { %v302_v57 = vmul.f32 %v286_v5, %v846_v12 }
 0x10c   :  { %v658_v8 = vpop.eup %657  ;;  %v303_v10 = vmul.f32 %v287_v6, %v850_v16 }
 0x10d   :  { %v660_v11 = vpop.eup %659  ;;  %v272_v13 = vmul.f32 0.5, %v658_v8  ;;  %v312_v14 = vpack.c.bf16 %v302_v57, %v300_v51 }
 0x10e   :  { %v662_v15 = vpop.eup %661  ;;  %v273_v17 = vmul.f32 0.5, %v660_v11  ;;  %v313_v18 = vpack.c.bf16 %v303_v10, %v301_v9 }
 0x10f   :  { %v664_v19 = vpop.eup %663  ;;  %v288_v20 = vadd.f32 0.5, %v272_v13  ;;  %v274_v21 = vmul.f32 0.5, %v662_v15 }
 0x110   :  { %v289_v22 = vadd.f32 0.5, %v273_v17  ;;  %v275_v23 = vmul.f32 0.5, %v664_v19  ;;  %467 = vmatprep.mubr.bf16.mxu1 %v313_v18 }
 0x111   :  { %v290_v2 = vadd.f32 0.5, %v274_v21  ;;  %468 = vmatmul.mubr.bf16.gmra.mrb[4].mxu1 %v312_v14  ;;  %v304_v24 = vmul.f32 %v288_v20, %v855_v30 }
 0x112   :  { %v291_v12 = vadd.f32 0.5, %v275_v23  ;;  %v305_v25 = vmul.f32 %v289_v22, %v222_v40 }
 0x113   :  { %v306_v7 = vmul.f32 %v290_v2, %v224_v42 }
 0x114   :  { %v307_v16 = vmul.f32 %v291_v12, %v226_v48 }
 0x115   :  { %v314_v26 = vpack.c.bf16 %v306_v7, %v304_v24 }
 0x116   :  { %v315_v27 = vpack.c.bf16 %v307_v16, %v305_v25 }
 0x118   :  { %475 = vmatprep.mubr.bf16.mxu1 %v315_v27 }
 0x119   :  { %476 = vmatmul.mubr.bf16.gmra.mrb[8].mxu1 %v314_v26 }
 0x1d4   :  { %v557_v28 = vpop.f32.mrb[16].mxu0 }
 0x1d5   :  { %v558_v31 = vpop.f32.mrb[17].mxu0 }
 0x1d6   :  { %v559_v32 = vadd.f32 %v558_v31, %v557_v28  ;;  %v560_v33 = vpop.f32.mrb[18].mxu0 }
 0x1d7   :  { %v561_v36 = vpop.f32.mrb[19].mxu0 }
 0x1d8   :  { %v454_v37 = vadd.f32 %v559_v32, %v524_v29  ;;  %v562_v38 = vadd.f32 %v561_v36, %v560_v33 }
 0x1da   :  { %484 = vst.msk [vmem:[#allocation2] sm:$0xff] %vm142_vm0, %v454_v37  ;;  %v457_v30 = vadd.f32 %v562_v38, %v524_v29 }
 0x1dc   :  { %485 = vst.msk [vmem:[#allocation2 + $0x8] sm:$0xff] %vm142_vm0, %v457_v30  ;;  %v563_v40 = vpop.f32.mrb[0].mxu1 }
 0x1dd   :  { %v564_v39 = vpop.f32.mrb[1].mxu1 }
 0x1de   :  { %v565_v41 = vadd.f32 %v564_v39, %v563_v40  ;;  %v566_v42 = vpop.f32.mrb[2].mxu1 }
 0x1df   :  { %v567_v43 = vpop.f32.mrb[3].mxu1 }
 0x1e0   :  { %v462_v44 = vadd.f32 %v565_v41, %v524_v29  ;;  %v568_v45 = vadd.f32 %v567_v43, %v566_v42 }
 0x1e2   :  { %486 = vst.msk [vmem:[#allocation2 + $0x10] sm:$0xff] %vm142_vm0, %v462_v44  ;;  %v465_v46 = vadd.f32 %v568_v45, %v524_v29 }
 0x1e4   :  { %487 = vst.msk [vmem:[#allocation2 + $0x18] sm:$0xff] %vm142_vm0, %v465_v46  ;;  %v569_v47 = vpop.f32.mrb[4].mxu1 }
 0x1e5   :  { %v570_v48 = vpop.f32.mrb[5].mxu1 }
 0x1e6   :  { %v571_v50 = vadd.f32 %v570_v48, %v569_v47  ;;  %v572_v52 = vpop.f32.mrb[6].mxu1 }
 0x1e7   :  { %v573_v53 = vpop.f32.mrb[7].mxu1 }
 0x1e8   :  { %v470_v55 = vadd.f32 %v571_v50, %v524_v29  ;;  %v574_v56 = vadd.f32 %v573_v53, %v572_v52 }
 0x1ea   :  { %488 = vst.msk [vmem:[#allocation2 + $0x20] sm:$0xff] %vm142_vm0, %v470_v55  ;;  %v473_v58 = vadd.f32 %v574_v56, %v524_v29 }
 0x1ec   :  { %489 = vst.msk [vmem:[#allocation2 + $0x28] sm:$0xff] %vm142_vm0, %v473_v58  ;;  %v575_v34 = vpop.f32.mrb[8].mxu1 }
 0x1ed   :  { %v576_v59 = vpop.f32.mrb[9].mxu1 }
 0x1ee   :  { %v577_v60 = vadd.f32 %v576_v59, %v575_v34  ;;  %v578_v61 = vpop.f32.mrb[10].mxu1 }
 0x1ef   :  { %v579_v35 = vpop.f32.mrb[11].mxu1 }
 0x1f0   :  { %v478_v62 = vadd.f32 %v577_v60, %v524_v29  ;;  %v580_v63 = vadd.f32 %v579_v35, %v578_v61 }
 0x1f2   :  { %490 = vst.msk [vmem:[#allocation2 + $0x30] sm:$0xff] %vm142_vm0, %v478_v62  ;;  %v481_v0 = vadd.f32 %v580_v63, %v524_v29 }
 0x1f4   :  { %491 = vst.msk [vmem:[#allocation2 + $0x38] sm:$0xff] %vm142_vm0, %v481_v0 }
 0x1f5   :  { %676 = shalt.err (!%p673_p4)
}
 0x1f6   :  { %s677_s0 = scalar_lea.hbm %s898_s5, 1024 }
 0x1f7   :  { %p678_p5 = scmp.ne.s32.totalorder %s898_s5, %s677_s0  ;;  %p681_p6 = scmp.lt.u32.totalorder %s677_s0, %s898_s5 }
 0x1f9   :  { %p683_p7 = pnand %p681_p6, %p678_p5 }
 0x1fb   :  { %686 = shalt.err (!%p683_p7)
}
 0x1fc   :  { %s691_s6 = smov 128   ;;  %s692_s7 = smov 8  }
 0x1fd   :  { %503 = dma.vmem_to_hbm [thread:$0]  %s498_s23, 1024, %s898_s5, [#allocation3], %s691_s6, %s691_s6, %s692_s7  }
 0x1fe   :  { %687 = dma.done.wait [#allocation3], 1024  }
 0x1ff   :  { %688 = vsyncadd [#allocation3], 4294966272 }
 0x200   :  { %507 = vsyncpa [#allocation3], 1 }

</bundles_post_ra>
